<compile_context>
chip_gen: v7x
topology: tpu7x:2x2x1
jax: 0.10.0
libtpu: 0.0.40
codegen_flags: <defaults>
</compile_context>

<pallas_src>
import jax
import jax.numpy as jnp
from jax.experimental import pallas as pl
from jax.experimental.pallas import tpu as pltpu


def mask_mlp_kernel(w1_ref, w2_ref, W1a_ref, W1b_ref, b1_ref,
                    W2_ref, b2_ref, W3_ref, o_ref):
    w_dt = W1a_ref.dtype                       # bf16 MXU dtype
    # In-kernel cast of the streamed activations (no wrapper-side convert pass).
    a1 = w1_ref[...].astype(w_dt)
    a2 = w2_ref[...].astype(w_dt)

    # ---- linear_1 on concat(w1, w2): split matmul, f32 accumulate ----
    h = (jnp.dot(a1, W1a_ref[...], preferred_element_type=jnp.float32)
         + jnp.dot(a2, W1b_ref[...], preferred_element_type=jnp.float32)
         + b1_ref[...])
    # ---- relu_1 (f32) ----
    h = jnp.maximum(h, 0.0).astype(w_dt)
    # ---- linear_2 ----
    h = jnp.dot(h, W2_ref[...], preferred_element_type=jnp.float32) + b2_ref[...]
    # ---- relu_2 (f32) ----
    h = jnp.maximum(h, 0.0).astype(w_dt)
    # ---- linear_3 (no bias) ----
    h = jnp.dot(h, W3_ref[...], preferred_element_type=jnp.float32)
    # ---- sigmoid: exp (EUP) + approx reciprocal (EUP) keeps the divide off the VPU ----
    o_ref[...] = pl.reciprocal(1.0 + jnp.exp(-h), approx=True).astype(o_ref.dtype)


def _pick_tb(B, S, *, min_steps=4):
    """Batch tile for the 1-D 'parallel' grid.

    Prefer the largest tile (up to 1024 rows, 2048 when S <= 256) that divides B while
    leaving at least `min_steps` grid steps: big tiles amortize the ~0.35us per-step
    overhead and get efficient DMAs, while >= 4 steps leaves each v7x TensorCore a
    >= 2-step pipeline (prefetch-next / writeback-prev overlap).  Falls back to
    >= 2 steps, then to the largest multiple-of-8 divisor of B (never a 1-step grid
    unless B has no multiple-of-8 divisor at all).
    """
    max_tb = 2048 if S <= 256 else 1024
    cands = [c for c in (2048, 1024, 512, 384, 256, 128, 64, 32, 16, 8) if c <= max_tb]
    for steps_req in (min_steps, 2):
        for cand in cands:
            if B % cand == 0 and B // cand >= steps_req:
                return cand
    top = min(B, max_tb) - (min(B, max_tb) % 8)
    for cand in range(top, 7, -8):
        if B % cand == 0:
            return cand
    return B  # block == full dim is still a legal BlockSpec


def _vmem_bytes_estimate(tb, S, act_itemsize, out_itemsize):
    acts = 2 * 2 * tb * S * act_itemsize           # w1 + w2 tiles, double-buffered
    outs = 2 * tb * S * out_itemsize               # output tile, double-buffered
    wts = 2 * (4 * S * S * 2 + 2 * S * 4)          # bf16 weights + f32 biases, 2 buffers
    return acts + outs + wts


def prepare_params(params, *, weight_dtype=jnp.bfloat16):
    """One-time cast of the weights to the MXU dtype (biases stay f32 for the f32
    bias/ReLU/sigmoid epilogue).  Do this once at init so repeated forward calls do
    not re-emit per-call f32->bf16 converts (an extra HBM round-trip over the weights)."""
    return {
        "W1a": jnp.asarray(params["W1a"], weight_dtype),
        "W1b": jnp.asarray(params["W1b"], weight_dtype),
        "W2": jnp.asarray(params["W2"], weight_dtype),
        "W3": jnp.asarray(params["W3"], weight_dtype),
        "b1": jnp.asarray(params["b1"], jnp.float32),
        "b2": jnp.asarray(params["b2"], jnp.float32),
    }


def mask_model_forward(w1, w2, params, *, tb=None, out_dtype=jnp.bfloat16, min_steps=4):
    """Fused MaskModel forward.

    w1, w2 : (B, S) activations in their *native* dtype (f32 is fine — the bf16 cast
             for the MXU happens inside the kernel, no wrapper-side convert pass).
    params : output of prepare_params() (bf16 weights, f32 biases).  jnp.asarray below
             is a no-op when params are already prepared.
    out_dtype : bf16 by default (sigmoid output is a [0,1] mask) — the fast path that
             halves output write bytes.  Pass jnp.float32 if a full-precision mask is
             required downstream.
    """
    B, S = w1.shape
    assert w2.shape == (B, S)
    tb = _pick_tb(B, S, min_steps=min_steps) if tb is None else tb
    assert B % tb == 0, f"batch {B} not divisible by tile {tb}"

    w_dt = jnp.bfloat16
    W1a = jnp.asarray(params["W1a"], w_dt)   # no-ops when params came from prepare_params
    W1b = jnp.asarray(params["W1b"], w_dt)
    W2 = jnp.asarray(params["W2"], w_dt)
    W3 = jnp.asarray(params["W3"], w_dt)
    b1 = jnp.asarray(params["b1"], jnp.float32)
    b2 = jnp.asarray(params["b2"], jnp.float32)
    args = (w1, w2, W1a, W1b, b1, W2, b2, W3)

    act_itemsize = jnp.dtype(w1.dtype).itemsize
    out_itemsize = jnp.dtype(out_dtype).itemsize
    cost = pl.CostEstimate(
        flops=8 * B * S * S,                              # (B,2S)@(2S,S) + 2x (B,S)@(S,S)
        transcendentals=2 * B * S,                        # exp + reciprocal
        bytes_accessed=(2 * B * S * act_itemsize          # w1, w2 (native dtype)
                        + 4 * S * S * 2 + 2 * S * 4       # bf16 weights + f32 biases
                        + B * S * out_itemsize))          # output

    # Only raise the scoped-VMEM limit if the pipeline buffers actually need it
    # (default scoped limit is 32 MiB on current generations).
    est = _vmem_bytes_estimate(tb, S, act_itemsize, out_itemsize)
    cp_kwargs = dict(dimension_semantics=("parallel",))
    needed = int(1.25 * est) + (4 << 20)
    if needed > 32 * 1024 * 1024:
        cp_kwargs["vmem_limit_bytes"] = min(needed, 64 * 1024 * 1024)

    act_spec = pl.BlockSpec((tb, S), lambda i: (i, 0))
    # Constant-index blocks: fetched once, resident across all grid steps.
    const_spec = lambda shape: pl.BlockSpec(shape, lambda i: (0, 0))

    call = pl.pallas_call(
        mask_mlp_kernel,
        out_shape=jax.ShapeDtypeStruct((B, S), out_dtype),
        grid_spec=pltpu.PrefetchScalarGridSpec(
            num_scalar_prefetch=0,
            grid=(B // tb,),
            in_specs=[
                act_spec,                  # w1 tile   (tb, S)
                act_spec,                  # w2 tile   (tb, S)
                const_spec(W1a.shape),     # W1 top    (S, S)
                const_spec(W1b.shape),     # W1 bottom (S, S)
                const_spec(b1.shape),      # b1        (1, S)
                const_spec(W2.shape),      # W2        (S, S)
                const_spec(b2.shape),      # b2        (1, S)
                const_spec(W3.shape),      # W3        (S, S)
            ],
            out_specs=act_spec,
        ),
        compiler_params=pltpu.CompilerParams(**cp_kwargs),
        cost_estimate=cost,
    )
    return call(*args)


def init_params(key, size):
    """Deterministic f32 init mimicking torch.nn.Linear default (uniform +/- 1/sqrt(fan_in)).
    Weights stored as (in_features, out_features)."""
    ks = jax.random.split(key, 6)
    in1 = 2 * size
    lim1 = 1.0 / jnp.sqrt(in1)
    lim2 = 1.0 / jnp.sqrt(size)
    W1 = jax.random.uniform(ks[0], (in1, size), jnp.float32, -lim1, lim1)
    b1 = jax.random.uniform(ks[1], (1, size), jnp.float32, -lim1, lim1)
    W2 = jax.random.uniform(ks[2], (size, size), jnp.float32, -lim2, lim2)
    b2 = jax.random.uniform(ks[3], (1, size), jnp.float32, -lim2, lim2)
    W3 = jax.random.uniform(ks[4], (size, size), jnp.float32, -lim2, lim2)
    return {
        "W1a": W1[:size],   # multiplies w1
        "W1b": W1[size:],   # multiplies w2
        "b1": b1,
        "W2": W2,
        "b2": b2,
        "W3": W3,
    }


def reference_forward(w1, w2, p):
    """Pure-JAX f32 reference of the PyTorch forward."""
    x = jnp.concatenate([w1, w2], axis=1)
    W1 = jnp.concatenate([p["W1a"], p["W1b"]], axis=0)
    h = jnp.maximum(x @ W1 + p["b1"], 0.0)
    h = jnp.maximum(h @ p["W2"] + p["b2"], 0.0)
    h = h @ p["W3"]
    return jax.nn.sigmoid(h)


if __name__ == "__main__":
    SIZE = 128    # "size" hyperparameter (PyTorch default is 512; small demo shape)
    BATCH = 512   # -> tb=128, 4 grid steps (>= 2 per v7x TensorCore)

    key = jax.random.PRNGKey(0)
    k_w1, k_w2, k_p = jax.random.split(key, 3)
    w1 = jax.random.normal(k_w1, (BATCH, SIZE), jnp.float32)
    w2 = jax.random.normal(k_w2, (BATCH, SIZE), jnp.float32)

    params_f32 = init_params(k_p, SIZE)
    params = prepare_params(params_f32)   # one-time bf16 weight cast, hoisted out of the call path

    out = mask_model_forward(w1, w2, params)
    out = jax.block_until_ready(out)

    ref = reference_forward(w1, w2, params_f32)
    assert out.shape == (BATCH, SIZE)
    assert out.dtype == jnp.bfloat16
    # bf16 weights/intermediates/output with f32 accumulation + approx reciprocal:
    # loosened tolerance vs the all-f32 reference (fine for a [0,1] mask).
    err = jnp.max(jnp.abs(out.astype(jnp.float32) - ref))
    assert jnp.allclose(out.astype(jnp.float32), ref, atol=3e-2), \
        f"mismatch vs JAX reference (max abs diff {err})"

    print("KERNEL_OK")
</pallas_src>

<mosaic_0001>
module attributes {stable_mosaic.version = 11 : i64} {
  func.func @mask_mlp_kernel(%arg0: i32, %arg1: memref<128x128xf32, #tpu.memory_space<vmem>>, %arg2: memref<128x128xf32, #tpu.memory_space<vmem>>, %arg3: memref<128x128xbf16, #tpu.memory_space<vmem>>, %arg4: memref<128x128xbf16, #tpu.memory_space<vmem>>, %arg5: memref<1x128xf32, #tpu.memory_space<vmem>>, %arg6: memref<128x128xbf16, #tpu.memory_space<vmem>>, %arg7: memref<1x128xf32, #tpu.memory_space<vmem>>, %arg8: memref<128x128xbf16, #tpu.memory_space<vmem>>, %arg9: memref<128x128xbf16, #tpu.memory_space<vmem>>) attributes {dimension_semantics = [#tpu.dimension_semantics<parallel>], iteration_bounds = array<i64: 4>, scalar_prefetch = 0 : i64, scratch_operands = 0 : i64, tpu.core_type = #tpu.core_type<tc>, window_params = [{transform_indices = @transform_0, window_bounds = array<i64: 128, 128>}, {transform_indices = @transform_1, window_bounds = array<i64: 128, 128>}, {pipeline_mode = #tpu.pipeline_mode<synchronous>, transform_indices = @transform_2, window_bounds = array<i64: 128, 128>}, {pipeline_mode = #tpu.pipeline_mode<synchronous>, transform_indices = @transform_3, window_bounds = array<i64: 128, 128>}, {pipeline_mode = #tpu.pipeline_mode<synchronous>, transform_indices = @transform_4, window_bounds = array<i64: 1, 128>}, {pipeline_mode = #tpu.pipeline_mode<synchronous>, transform_indices = @transform_5, window_bounds = array<i64: 128, 128>}, {pipeline_mode = #tpu.pipeline_mode<synchronous>, transform_indices = @transform_6, window_bounds = array<i64: 1, 128>}, {pipeline_mode = #tpu.pipeline_mode<synchronous>, transform_indices = @transform_7, window_bounds = array<i64: 128, 128>}, {transform_indices = @transform_8, window_bounds = array<i64: 128, 128>}]} {
    %c0 = arith.constant 0 : index
    %c0_0 = arith.constant 0 : index
    %0 = vector.load %arg1[%c0, %c0_0] : memref<128x128xf32, #tpu.memory_space<vmem>>, vector<128x128xf32>
    %1 = arith.truncf %0 : vector<128x128xf32> to vector<128x128xbf16>
    %c0_1 = arith.constant 0 : index
    %c0_2 = arith.constant 0 : index
    %2 = vector.load %arg2[%c0_1, %c0_2] : memref<128x128xf32, #tpu.memory_space<vmem>>, vector<128x128xf32>
    %3 = arith.truncf %2 : vector<128x128xf32> to vector<128x128xbf16>
    %c0_3 = arith.constant 0 : index
    %c0_4 = arith.constant 0 : index
    %4 = vector.load %arg3[%c0_3, %c0_4] : memref<128x128xbf16, #tpu.memory_space<vmem>>, vector<128x128xbf16>
    %cst = arith.constant dense<0.000000e+00> : vector<128x128xf32>
    %5 = tpu.matmul %1, %4, %cst {dimension_numbers = #tpu.dot_dimension_numbers<[1], [0], [0], [1], [0, 0, 1, 1], [], []>} : vector<128x128xbf16>, vector<128x128xbf16>, vector<128x128xf32> -> vector<128x128xf32>
    %c0_5 = arith.constant 0 : index
    %c0_6 = arith.constant 0 : index
    %6 = vector.load %arg4[%c0_5, %c0_6] : memref<128x128xbf16, #tpu.memory_space<vmem>>, vector<128x128xbf16>
    %cst_7 = arith.constant dense<0.000000e+00> : vector<128x128xf32>
    %7 = tpu.matmul %3, %6, %cst_7 {dimension_numbers = #tpu.dot_dimension_numbers<[1], [0], [0], [1], [0, 0, 1, 1], [], []>} : vector<128x128xbf16>, vector<128x128xbf16>, vector<128x128xf32> -> vector<128x128xf32>
    %8 = arith.addf %5, %7 : vector<128x128xf32>
    %c0_8 = arith.constant 0 : index
    %c0_9 = arith.constant 0 : index
    %9 = vector.load %arg5[%c0_8, %c0_9] : memref<1x128xf32, #tpu.memory_space<vmem>>, vector<1x128xf32>
    %10 = vector.broadcast %9 : vector<1x128xf32> to vector<128x128xf32>
    %11 = arith.addf %8, %10 : vector<128x128xf32>
    %cst_10 = arith.constant 0.000000e+00 : f32
    %12 = vector.broadcast %cst_10 : f32 to vector<128x128xf32>
    %13 = arith.maximumf %11, %12 : vector<128x128xf32>
    %14 = arith.truncf %13 : vector<128x128xf32> to vector<128x128xbf16>
    %c0_11 = arith.constant 0 : index
    %c0_12 = arith.constant 0 : index
    %15 = vector.load %arg6[%c0_11, %c0_12] : memref<128x128xbf16, #tpu.memory_space<vmem>>, vector<128x128xbf16>
    %cst_13 = arith.constant dense<0.000000e+00> : vector<128x128xf32>
    %16 = tpu.matmul %14, %15, %cst_13 {dimension_numbers = #tpu.dot_dimension_numbers<[1], [0], [0], [1], [0, 0, 1, 1], [], []>} : vector<128x128xbf16>, vector<128x128xbf16>, vector<128x128xf32> -> vector<128x128xf32>
    %c0_14 = arith.constant 0 : index
    %c0_15 = arith.constant 0 : index
    %17 = vector.load %arg7[%c0_14, %c0_15] : memref<1x128xf32, #tpu.memory_space<vmem>>, vector<1x128xf32>
    %18 = vector.broadcast %17 : vector<1x128xf32> to vector<128x128xf32>
    %19 = arith.addf %16, %18 : vector<128x128xf32>
    %cst_16 = arith.constant 0.000000e+00 : f32
    %20 = vector.broadcast %cst_16 : f32 to vector<128x128xf32>
    %21 = arith.maximumf %19, %20 : vector<128x128xf32>
    %22 = arith.truncf %21 : vector<128x128xf32> to vector<128x128xbf16>
    %c0_17 = arith.constant 0 : index
    %c0_18 = arith.constant 0 : index
    %23 = vector.load %arg8[%c0_17, %c0_18] : memref<128x128xbf16, #tpu.memory_space<vmem>>, vector<128x128xbf16>
    %cst_19 = arith.constant dense<0.000000e+00> : vector<128x128xf32>
    %24 = tpu.matmul %22, %23, %cst_19 {dimension_numbers = #tpu.dot_dimension_numbers<[1], [0], [0], [1], [0, 0, 1, 1], [], []>} : vector<128x128xbf16>, vector<128x128xbf16>, vector<128x128xf32> -> vector<128x128xf32>
    %cst_20 = arith.constant 0.000000e+00 : f32
    %25 = vector.broadcast %cst_20 : f32 to vector<128x128xf32>
    %26 = arith.subf %25, %24 : vector<128x128xf32>
    %27 = math.exp %26 : vector<128x128xf32>
    %cst_21 = arith.constant 1.000000e+00 : f32
    %28 = vector.broadcast %cst_21 : f32 to vector<128x128xf32>
    %29 = arith.addf %28, %27 : vector<128x128xf32>
    %30 = tpu.reciprocal %29 {approx = true} : vector<128x128xf32> -> vector<128x128xf32>
    %31 = arith.truncf %30 : vector<128x128xf32> to vector<128x128xbf16>
    %c0_22 = arith.constant 0 : index
    %c0_23 = arith.constant 0 : index
    %32 = vector.load %arg9[%c0_22, %c0_23] : memref<128x128xbf16, #tpu.memory_space<vmem>>, vector<128x128xbf16>
    tpu.vector_store %arg9[%c0_22, %c0_23], %31 {strides = array<i32>} : memref<128x128xbf16, #tpu.memory_space<vmem>>, vector<128x128xbf16>,
    return
  }
  func.func @transform_0(%arg0: i32) -> (i32, i32) {
    %c0_i32 = arith.constant 0 : i32
    %c0_i32_0 = arith.constant 0 : i32
    return %arg0, %c0_i32 : i32, i32
  }
  func.func @transform_1(%arg0: i32) -> (i32, i32) {
    %c0_i32 = arith.constant 0 : i32
    %c0_i32_0 = arith.constant 0 : i32
    return %arg0, %c0_i32 : i32, i32
  }
  func.func @transform_2(%arg0: i32) -> (i32, i32) {
    %c0_i32 = arith.constant 0 : i32
    %c0_i32_0 = arith.constant 0 : i32
    %c0_i32_1 = arith.constant 0 : i32
    return %c0_i32, %c0_i32_0 : i32, i32
  }
  func.func @transform_3(%arg0: i32) -> (i32, i32) {
    %c0_i32 = arith.constant 0 : i32
    %c0_i32_0 = arith.constant 0 : i32
    %c0_i32_1 = arith.constant 0 : i32
    return %c0_i32, %c0_i32_0 : i32, i32
  }
  func.func @transform_4(%arg0: i32) -> (i32, i32) {
    %c0_i32 = arith.constant 0 : i32
    %c0_i32_0 = arith.constant 0 : i32
    %c0_i32_1 = arith.constant 0 : i32
    return %c0_i32, %c0_i32_0 : i32, i32
  }
  func.func @transform_5(%arg0: i32) -> (i32, i32) {
    %c0_i32 = arith.constant 0 : i32
    %c0_i32_0 = arith.constant 0 : i32
    %c0_i32_1 = arith.constant 0 : i32
    return %c0_i32, %c0_i32_0 : i32, i32
  }
  func.func @transform_6(%arg0: i32) -> (i32, i32) {
    %c0_i32 = arith.constant 0 : i32
    %c0_i32_0 = arith.constant 0 : i32
    %c0_i32_1 = arith.constant 0 : i32
    return %c0_i32, %c0_i32_0 : i32, i32
  }
  func.func @transform_7(%arg0: i32) -> (i32, i32) {
    %c0_i32 = arith.constant 0 : i32
    %c0_i32_0 = arith.constant 0 : i32
    %c0_i32_1 = arith.constant 0 : i32
    return %c0_i32, %c0_i32_0 : i32, i32
  }
  func.func @transform_8(%arg0: i32) -> (i32, i32) {
    %c0_i32 = arith.constant 0 : i32
    %c0_i32_0 = arith.constant 0 : i32
    return %arg0, %c0_i32 : i32, i32
  }
}

</mosaic_0001>

<bundles_post_ra>
// kernel: tpu_custom_call.1
= control target key start
LH: loop header
LB: loop body
LE: loop exit
PB: predicated region body
PF: predicated region fallthrough
CT: control target
= control target key end

     0   :  { %s2778_s0 = inlined_call_operand.hbm [shape: f32[512,128], index: 0, kind: input, shape index: {}]   ;;  %s2779_s1 = inlined_call_operand.hbm [shape: f32[512,128], index: 1, kind: input, shape index: {}]   ;;  %s2780_s2 = inlined_call_operand.hbm [shape: bf16[128,128], index: 2, kind: input, shape index: {}]   ;;  %s2781_s3 = inlined_call_operand.hbm [shape: bf16[128,128], index: 3, kind: input, shape index: {}]   ;;  %s2782_s4 = inlined_call_operand.vmem [shape: f32[1,128], index: 4, kind: input, shape index: {}]   ;;  %s2783_s5 = inlined_call_operand.hbm [shape: bf16[128,128], index: 5, kind: input, shape index: {}]   ;;  %s2784_s6 = inlined_call_operand.vmem [shape: f32[1,128], index: 6, kind: input, shape index: {}]   ;;  %s2785_s7 = inlined_call_operand.hbm [shape: bf16[128,128], index: 7, kind: input, shape index: {}]   ;;  %s2786_s8 = inlined_call_operand.hbm [shape: bf16[512,128], index: 8, kind: output, shape index: {}]  }
   0x1   :  { %2792 = sst [smem:[#allocation22_spill]] %s2778_s0 }
   0x2   :  { %2793 = sst [smem:[#allocation23_spill]] %s2780_s2 }
   0x3   :  { %2794 = sst [smem:[#allocation24_spill]] %s2781_s3 }
   0x4   :  { %13 = vsyncpa [#allocation3], 0 }
   0x5   :  { %15 = vsyncpa [#allocation3 + $0x1], 0 }
   0x6   :  { %16 = vsyncpa [#allocation6], 0 }
   0x7   :  { %18 = vsyncpa [#allocation6 + $0x1], 0 }
   0x8   :  { %19 = vsyncpa [#allocation9], 0 }
   0x9   :  { %20 = vsyncpa [#allocation12], 0 }
   0xa   :  { %21 = vsyncpa [#allocation4], 0 }
   0xb   :  { %23 = vsyncpa [#allocation4 + $0x1], 0  ;;  %s2362_s27 = smov 0   ;;  %s2364_s28 = smov 0  }
   0xc   :  { %s2366_s29 = smov 0   ;;  %s2368_s30 = smov 0  }
   0xd LB: > { %2795 = sst [smem:[#allocation20_spill]] %s2290_s27  ;;  %s2383_s9 = sadd.s32 4294967295, %s2302_s30   ;;  %s2302_s30 = sphi %s2368_s30, %s2822_s30   ;;  %s2298_s29 = sphi %s2366_s29, %s2821_s29   ;;  %s2294_s28 = sphi %s2364_s28, %s2820_s28   ;;  %s2290_s27 = sphi %s2362_s27, %s2819_s27  }
   0xe   : > { %s1504_s10 = sadd.s32 4294967294, %s2302_s30   ;;  %p49_p0 = scmp.ne.s32.totalorder %s2294_s28, %s2290_s27 }
   0xf   : > { %p2787_p1 = scmp.eq.s32.totalorder %s2383_s9, 0  ;;  %p231_p3 = scmp.eq.s32.totalorder %s1504_s10, 3 }
  0x10   : > { %p1505_p5 = scmp.ge.s32.totalorder %s2302_s30, 1  ;;  %p238_p7 = scmp.lt.s32.totalorder %s2302_s30, 5 }
  0x11   : > { %p2392_p4 = por %p2787_p1, %p49_p0  ;;  %p2397_p6 = por %p231_p3, %p49_p0 }
  0x12   : > { %p2402_p8 = pnand %p1505_p5, %p238_p7  ;;  %s2304_s14 = smov [#allocation7]  }
  0x13   : > { %s2796_s11 = scalar_select %p2392_p4, 1, 0 }
  0x14   : > { %s2797_s12 = scalar_select %p2397_p6, 1, 0 }
  0x15   : > { %s2799_s13 = scalar_select %p2402_p8, 1, 0 }
  0x16   : > { %2798 = sst [smem:[#allocation21_spill]] %s2797_s12  ;;  %s250_s15 = sshll.u32 %s2304_s14, 4  ;;  %s2406_s15 = int_to_ptr.vmem [resolvable:$true] %s250_s15 }
  0x17   : > { %p1876_p9 = pneg %p2402_p8  ;;  %s2305_s17 = smov [#allocation8]  }
  0x18   : > { %s263_s18 = sshll.u32 %s2305_s17, 4  ;;  %s2306_s19 = smov [#allocation10]   ;;  %s2416_s18 = int_to_ptr.vmem [resolvable:$true] %s263_s18 }
  0x19   : > { %p2412_p10 = pnand %p1876_p9, %p2787_p1  ;;  %s2418_s20 = sshll.u32 %s2306_s19, 4  ;;  %s280_s20 = int_to_ptr.vmem [resolvable:$true] %s2418_s20 }
  0x1a   : > { %s2801_s2 = sld [smem:[#allocation23_spill]] }
  0x1b   : > { %p2428_p12 = pneg %p2412_p10 }
  0x20   : > { %s2048_s23 = scalar_lea.hbm %s2801_s2, 1024 }
  0x21   : > { %p2049_p11 = scmp.ne.s32.totalorder %s2801_s2, %s2048_s23  ;;  %p2055_p3 = scmp.lt.u32.totalorder %s2048_s23, %s2801_s2 }
  0x23   : > { %p2051_p13 = pnand %p2428_p12, %p2049_p11 }
  0x25   : > { %p2052_p0 = pneg %p2051_p13 }
  0x27   : > { %p2057_p5 = pnand %p2055_p3, %p2052_p0 }
  0x29   : > { %2060 = shalt.err (!%p2057_p5)
}
  0x2a   : > { %s2061_s17 = scalar_lea.vmem %s2406_s15, 1024  ;;  %p2069_p2 = scmp.lt.s32.totalorder %s2406_s15, %s2406_s15 }
  0x2b   : > { %p2062_p7 = scmp.ne.s32.totalorder %s2406_s15, %s2061_s17  ;;  %p2070_p6 = scmp.lt.s32.totalorder %s2061_s17, %s2061_s17 }
  0x2d   : > { %p2064_p9 = pnand %p2062_p7, %p2428_p12  ;;  %p2071_p11 = por %p2070_p6, %p2069_p2 }
  0x2f   : > { %p2065_p1 = pneg %p2064_p9 }
  0x31   : > { %p2072_p13 = pnand %p2071_p11, %p2065_p1 }
  0x33   : > { %2075 = shalt.err (!%p2072_p13)
}
  0x34   : > { %s2307_s19 = smov 64   ;;  %s2308_s21 = smov 4  }
  0x35   : > { %1879 = dma.hbm_to_vmem [thread:$0]  (!%p2412_p10), %s2801_s2, 1024, %s2406_s15, [#allocation6], %s2307_s19, %s2307_s19, %s2308_s21  }
  0x36   : > { %s2803_s3 = sld [smem:[#allocation24_spill]] }
  0x3c   : > { %s2076_s10 = scalar_lea.hbm %s2803_s3, 1024 }
  0x3d   : > { %p2077_p1 = scmp.ne.s32.totalorder %s2803_s3, %s2076_s10  ;;  %p2083_p0 = scmp.lt.u32.totalorder %s2076_s10, %s2803_s3 }
  0x3f   : > { %p2079_p2 = pnand %p2077_p1, %p2428_p12 }
  0x41   : > { %p2080_p6 = pneg %p2079_p2 }
  0x43   : > { %p2085_p3 = pnand %p2083_p0, %p2080_p6 }
  0x45   : > { %2088 = shalt.err (!%p2085_p3)
}
  0x46   : > { %s2089_s15 = scalar_lea.vmem %s2416_s18, 1024  ;;  %p2097_p11 = scmp.lt.s32.totalorder %s2416_s18, %s2416_s18 }
  0x47   : > { %p2090_p5 = scmp.ne.s32.totalorder %s2416_s18, %s2089_s15  ;;  %p2098_p13 = scmp.lt.s32.totalorder %s2089_s15, %s2089_s15 }
  0x49   : > { %p2092_p7 = pnand %p2090_p5, %p2428_p12  ;;  %p2099_p1 = por %p2098_p13, %p2097_p11 }
  0x4b   : > { %p2093_p9 = pneg %p2092_p7 }
  0x4d   : > { %p2100_p2 = pnand %p2099_p1, %p2093_p9 }
  0x4f   : > { %2103 = shalt.err (!%p2100_p2)
}
  0x50   : > { %1882 = dma.hbm_to_vmem [thread:$0]  (!%p2412_p10), %s2803_s3, 1024, %s2416_s18, [#allocation9], %s2307_s19, %s2307_s19, %s2308_s21  }
  0x51   : > { %s2104_s24 = scalar_lea.hbm %s2783_s5, 1024 }
  0x52   : > { %p2105_p6 = scmp.ne.s32.totalorder %s2783_s5, %s2104_s24  ;;  %p2111_p5 = scmp.lt.u32.totalorder %s2104_s24, %s2783_s5 }
  0x54   : > { %p2107_p0 = pnand %p2105_p6, %p2428_p12 }
  0x56   : > { %p2108_p3 = pneg %p2107_p0 }
  0x58   : > { %p2113_p7 = pnand %p2111_p5, %p2108_p3 }
  0x5a   : > { %2116 = shalt.err (!%p2113_p7)
}
  0x5b   : > { %s2117_s15 = scalar_lea.vmem %s280_s20, 1024  ;;  %p2125_p1 = scmp.lt.s32.totalorder %s280_s20, %s280_s20 }
  0x5c   : > { %p2118_p9 = scmp.ne.s32.totalorder %s280_s20, %s2117_s15  ;;  %p2126_p2 = scmp.lt.s32.totalorder %s2117_s15, %s2117_s15 }
  0x5e   : > { %p2120_p11 = pnand %p2118_p9, %p2428_p12  ;;  %p2127_p4 = por %p2126_p2, %p2125_p1 }
  0x60   : > { %p2121_p13 = pneg %p2120_p11 }
  0x62   : > { %p2128_p8 = pnand %p2127_p4, %p2121_p13 }
  0x64   : > { %2131 = shalt.err (!%p2128_p8)
}
  0x65   : > { %1885 = dma.hbm_to_vmem [thread:$0]  (!%p2412_p10), %s2783_s5, 1024, %s280_s20, [#allocation9], %s2307_s19, %s2307_s19, %s2308_s21  }
  0x66   : > { %s2309_s12 = smov [#allocation11]   ;;  %s2132_s25 = scalar_lea.hbm %s2785_s7, 1024 }
  0x67   : > { %s295_s22 = sshll.u32 %s2309_s12, 4  ;;  %p2133_p4 = scmp.ne.s32.totalorder %s2785_s7, %s2132_s25  ;;  %s296_s22 = int_to_ptr.vmem [resolvable:$true] %s295_s22 }
  0x68   : > { %p2139_p0 = scmp.lt.u32.totalorder %s2132_s25, %s2785_s7 }
  0x69   : > { %p2135_p8 = pnand %p2133_p4, %p2428_p12 }
  0x6b   : > { %p2136_p6 = pneg %p2135_p8 }
  0x6d   : > { %p2141_p3 = pnand %p2139_p0, %p2136_p6 }
  0x6f   : > { %2144 = shalt.err (!%p2141_p3)
}
  0x70   : > { %s2145_s20 = scalar_lea.vmem %s296_s22, 1024  ;;  %p2153_p11 = scmp.lt.s32.totalorder %s296_s22, %s296_s22 }
  0x71   : > { %p2146_p5 = scmp.ne.s32.totalorder %s296_s22, %s2145_s20  ;;  %p2154_p13 = scmp.lt.s32.totalorder %s2145_s20, %s2145_s20 }
  0x73   : > { %p2148_p7 = pnand %p2146_p5, %p2428_p12  ;;  %p2155_p1 = por %p2154_p13, %p2153_p11 }
  0x75   : > { %p2149_p9 = pneg %p2148_p7 }
  0x77   : > { %p2156_p2 = pnand %p2155_p1, %p2149_p9 }
  0x79   : > { %2159 = shalt.err (!%p2156_p2)
}
  0x7a   : > { %1888 = dma.hbm_to_vmem [thread:$0]  (!%p2412_p10), %s2785_s7, 1024, %s296_s22, [#allocation12], %s2307_s19, %s2307_s19, %s2308_s21  }
  0x7b   : > { %s2522_s16 = sadd.s32 1, %s2302_s30   ;;  %s36_s26 = sadd.s32 1, %s2298_s29 }
  0x7c   : > { %s33_s12 = ssub.s32 %s2302_s30, %s2522_s16  ;;  %p43_p12 = scmp.ne.s32.totalorder %s2298_s29, %s2294_s28 }
  0x7d   : > { %p34_p4 = scmp.eq.s32.totalorder %s33_s12, 0  ;;  %p44_p8 = scmp.eq.s32.totalorder %s2302_s30, 0 }
  0x7e   : > { %p2804_p6 = scmp.eq.s32.totalorder %s2383_s9, 3  ;;  %p1904_p3 = scmp.lt.s32.totalorder %s2302_s30, 4 }
  0x7f   : > { %s2538_s24 = scalar_select %p34_p4, %s2298_s29, %s36_s26  }
  0x80   : > { %p2532_p0 = por %p2804_p6, %p43_p12  ;;  %p45_p5 = por %p44_p8, %p43_p12 }
  0x81   : > { %s309_s25 = sand.u32 1, %s2298_s29   ;;  %s1580_s19 = sshll.u32 %s2302_s30, 11 }
  0x82   : > { %s2541_s10 = sshll.u32 %s309_s25, 7  ;;  %s2806_s0 = sld [smem:[#allocation22_spill]] }
  0x83   : > { %s313_s17 = scalar_lea.vmem [#allocation2], %s2541_s10  ;;  %p2554_p10 = pnand %p1904_p3, %p45_p5 }
  0x84   : > { %s320_s15 = sshll.u32 %s313_s17, 4  ;;  %s2558_s18 = scalar_lea.sflag [#allocation3], %s309_s25  ;;  %s2552_s15 = int_to_ptr.vmem [resolvable:$true] %s320_s15 }
  0x85   : > { %p2162_p9 = pneg %p2554_p10 }
  0x88   : > { %s2549_s14 = scalar_lea.hbm %s2806_s0, %s1580_s19  ;;  %s2165_s21 = scalar_lea.hbm %s2806_s0, 8192 }
  0x89   : > { %s2160_s27 = scalar_lea.hbm %s2549_s14, 2048  ;;  %p2166_p1 = scmp.lt.u32.totalorder %s2549_s14, %s2806_s0 }
  0x8a   : > { %p2161_p7 = scmp.ne.s32.totalorder %s2549_s14, %s2160_s27  ;;  %p2167_p2 = scmp.lt.u32.totalorder %s2165_s21, %s2160_s27 }
  0x8b   : > { %p2169_p4 = scmp.lt.u32.totalorder %s2160_s27, %s2549_s14 }
  0x8c   : > { %p2163_p11 = pnand %p2162_p9, %p2161_p7  ;;  %p2168_p12 = por %p2167_p2, %p2166_p1 }
  0x8e   : > { %p2164_p13 = pneg %p2163_p11  ;;  %p2170_p8 = por %p2169_p4, %p2168_p12 }
  0x90   : > { %p2171_p6 = pnand %p2170_p8, %p2164_p13 }
  0x92   : > { %2174 = shalt.err (!%p2171_p6)
}
  0x93   : > { %s2175_s25 = scalar_lea.vmem %s2552_s15, 2048  ;;  %s2310_s26 = smov [#allocation2]  }
  0x94   : > { %p2176_p3 = scmp.ne.s32.totalorder %s2552_s15, %s2175_s25  ;;  %s2180_s12 = sshll.u32 %s2310_s26, 4  ;;  %s2181_s12 = int_to_ptr.vmem [resolvable:$false] %s2180_s12 }
  0x95   : > { %s2182_s22 = scalar_lea.vmem %s2181_s12, 4096  ;;  %p2183_p11 = scmp.lt.s32.totalorder %s2552_s15, %s2181_s12 }
  0x96   : > { %p2178_p5 = pnand %p2176_p3, %p2162_p9  ;;  %p2184_p1 = scmp.lt.s32.totalorder %s2182_s22, %s2175_s25 }
  0x98   : > { %p2179_p7 = pneg %p2178_p5  ;;  %p2185_p2 = por %p2184_p1, %p2183_p11 }
  0x9a   : > { %p2186_p12 = pnand %p2185_p2, %p2179_p7 }
  0x9c   : > { %2189 = shalt.err (!%p2186_p12)
}
  0x9d   : > { %s2311_s27 = smov 128   ;;  %s2312_s21 = smov 8  }
  0x9e   : > { %1892 = dma.hbm_to_vmem [thread:$0]  (!%p2554_p10), %s2549_s14, 2048, %s2552_s15, %s2558_s18, %s2311_s27, %s2311_s27, %s2312_s21  }
  0x9f   : > { %s2594_s26 = scalar_lea.hbm %s2779_s1, %s1580_s19  ;;  %s334_s12 = scalar_lea.vmem [#allocation5], %s2541_s10 }
  0xa0   : > { %s341_s22 = sshll.u32 %s334_s12, 4  ;;  %s330_s0 = sand.u32 1, %s2302_s30   ;;  %s2597_s22 = int_to_ptr.vmem [resolvable:$true] %s341_s22 }
  0xa1   : > { %s2600_s2 = scalar_lea.sflag [#allocation6], %s330_s0  ;;  %s2190_s3 = scalar_lea.hbm %s2594_s26, 2048 }
  0xa2   : > { %p2191_p13 = scmp.ne.s32.totalorder %s2594_s26, %s2190_s3  ;;  %s2195_s15 = scalar_lea.hbm %s2779_s1, 8192 }
  0xa3   : > { %p2196_p6 = scmp.lt.u32.totalorder %s2594_s26, %s2779_s1  ;;  %p2197_p3 = scmp.lt.u32.totalorder %s2195_s15, %s2190_s3 }
  0xa4   : > { %p2193_p4 = pnand %p2191_p13, %p2162_p9  ;;  %p2199_p7 = scmp.lt.u32.totalorder %s2190_s3, %s2594_s26 }
  0xa5   : > { %p2198_p5 = por %p2197_p3, %p2196_p6 }
  0xa6   : > { %p2194_p8 = pneg %p2193_p4 }
  0xa7   : > { %p2200_p11 = por %p2199_p7, %p2198_p5 }
  0xa9   : > { %p2201_p1 = pnand %p2200_p11, %p2194_p8 }
  0xab   : > { %2204 = shalt.err (!%p2201_p1)
}
  0xac   : > { %s2205_s0 = scalar_lea.vmem %s2597_s22, 2048  ;;  %s2313_s10 = smov [#allocation5]  }
  0xad   : > { %p2206_p2 = scmp.ne.s32.totalorder %s2597_s22, %s2205_s0  ;;  %s2210_s25 = sshll.u32 %s2313_s10, 4  ;;  %s2211_s25 = int_to_ptr.vmem [resolvable:$false] %s2210_s25 }
  0xae   : > { %s2212_s12 = scalar_lea.vmem %s2211_s25, 4096  ;;  %p2213_p4 = scmp.lt.s32.totalorder %s2597_s22, %s2211_s25 }
  0xaf   : > { %p2208_p12 = pnand %p2206_p2, %p2162_p9  ;;  %p2214_p6 = scmp.lt.s32.totalorder %s2212_s12, %s2205_s0 }
  0xb1   : > { %p2209_p13 = pneg %p2208_p12  ;;  %p2215_p3 = por %p2214_p6, %p2213_p4 }
  0xb3   : > { %p2216_p5 = pnand %p2215_p3, %p2209_p13 }
  0xb5   : > { %2219 = shalt.err (!%p2216_p5)
}
  0xb6   : > { %1895 = dma.hbm_to_vmem [thread:$0]  (!%p2554_p10), %s2594_s26, 2048, %s2597_s22, %s2600_s2, %s2311_s27, %s2311_s27, %s2312_s21  }
  0xb7   : > { %p2808_p9 = scmp.ne.s32.totalorder %s2799_s13, 0 }
  0xb8   : > { %s2632_s3 = sand.u32 (!%p2808_p9), 1, %s2294_s28   ;;  %p2809_p8 = scmp.ne.s32.totalorder (!%p2808_p9), %s2796_s11, 0 }
  0xb9   : > { %353 = sbr.rel (%p2808_p9) target bundleno = 1000 (0x3e8), region = 52  ;;  %s1518_s14 = sshll.u32 (!%p2808_p9), %s2632_s3, 7 }
  0xba   : > { %s356_s19 = scalar_lea.sflag (!%p2808_p9), [#allocation3], %s2632_s3  ;;  %s2636_s15 = scalar_lea.vmem (!%p2808_p9), [#allocation2], %s1518_s14 }
  0xc0   : > { %2265 = dma.done.wait (%p2809_p8), %s356_s19, 2048  }
  0xc1   : > { %2267 = vsyncadd (%p2809_p8), %s356_s19, 4294965248  ;;  %s364_s2 = sand.u32 1, %s2383_s9   ;;  %s2643_s20 = scalar_lea.vmem [#allocation5], %s1518_s14 }
  0xc2   : > { %s365_s13 = scalar_lea.sflag [#allocation6], %s364_s2 }
  0xc3   : > { %2269 = dma.done.wait (%p2809_p8), %s365_s13, 2048  }
  0xc4   : > { %2271 = vsyncadd (%p2809_p8), %s365_s13, 4294965248  ;;  %p2810_p10 = scmp.eq.s32.totalorder %s2383_s9, 0 }
  0xc6   : > { %2273 = dma.done.wait (%p2810_p10), [#allocation6], 1024   ;;  %p2811_p7 = pmov %p2810_p10 }
  0xc8   : > { %2275 = vsyncadd (%p2811_p7), [#allocation6], 4294966272  ;;  %p2812_p11 = pmov %p2811_p7 }
  0xc9   : > { %p2813_p1 = pmov %p2811_p7 }
  0xca   : > { %2277 = dma.done.wait (%p2812_p11), [#allocation9], 2048  }
  0xcb   : > { %2279 = vsyncadd (%p2813_p1), [#allocation9], 4294965248  ;;  %p2814_p2 = pmov %p2813_p1 }
  0xcc   : > { %p2815_p12 = pmov %p2813_p1 }
  0xcd   : > { %2281 = dma.done.wait (%p2814_p2), [#allocation12], 1024  }
  0xce   : > { %2283 = vsyncadd (%p2815_p12), [#allocation12], 4294966272  ;;  %v1952_v0 = vld [vmem:[#allocation8] sm:$0xff]   ;;  %v1953_v1 = vld [vmem:[#allocation8 + $0x8] sm:$0xff]   ;;  %s1524_s22 = sshll.u32 %s2632_s3, 6  ;;  %s1598_s17 = sshll.u32 %s2383_s9, 10 }
  0xcf   : > { %1710 = vmatprep.subr.bf16.mxu0 %v1952_v0  ;;  %v1954_v2 = vld [vmem:[#allocation8 + $0x10] sm:$0xff]   ;;  %v1955_v3 = vld [vmem:[#allocation8 + $0x18] sm:$0xff]   ;;  %v450_v4 = vld [vmem:[%s2643_s20] sm:$0xff]  ;;  %s2718_s18 = scalar_lea.vmem [#allocation13], %s1524_s22  ;;  %s2731_s12 = scalar_lea.hbm %s2786_s8, %s1598_s17 }
  0xd0   : > { %1711 = vmatpush3.bf16.msra.mxu0 %v1952_v0  ;;  %v451_v5 = vld [vmem:[%s2643_s20 + $0x8] sm:$0xff]  ;;  %v1956_v7 = vld [vmem:[#allocation8 + $0x20] sm:$0xff]   ;;  %v1958_v9 = vld [vmem:[#allocation8 + $0x30] sm:$0xff]   ;;  %s1370_s0 = sshll.u32 %s2718_s18, 4  ;;  %s1357_s14 = scalar_lea.sflag [#allocation4], %s2632_s3  ;;  %s2733_s0 = int_to_ptr.vmem [resolvable:$true] %s1370_s0 }
  0xd1   : > { %1712 = vmatprep.subr.bf16.mxu0 %v1953_v1  ;;  %v466_v6 = vpack.c.bf16 %v451_v5, %v450_v4  ;;  %v1957_v8 = vld [vmem:[#allocation8 + $0x28] sm:$0xff]   ;;  %v1959_v10 = vld [vmem:[#allocation8 + $0x38] sm:$0xff]   ;;  %v452_v11 = vld [vmem:[%s2643_s20 + $0x10] sm:$0xff]  ;;  %s2220_s9 = scalar_lea.vmem %s2733_s0, 1024  ;;  %s2314_s19 = smov [#allocation13]  }
  0xd2   : > { %v453_v12 = vld [vmem:[%s2643_s20 + $0x18] sm:$0xff]  ;;  %v1960_v13 = vld [vmem:[#allocation7] sm:$0xff]   ;;  %v455_v15 = vld [vmem:[%s2643_s20 + $0x28] sm:$0xff]  ;;  %p2221_p13 = scmp.ne.s32.totalorder %s2733_s0, %s2220_s9 }
  0xd3   : > { %1726 = vmatprep.mubr.bf16.mxu0 %v466_v6  ;;  %v454_v14 = vld [vmem:[%s2643_s20 + $0x20] sm:$0xff]  ;;  %v1969_v17 = vld [vmem:[#allocation10 + $0x8] sm:$0xff]   ;;  %v467_v18 = vpack.c.bf16 %v453_v12, %v452_v11  ;;  %v1970_v21 = vld [vmem:[#allocation10 + $0x10] sm:$0xff]  }
  0xd4   : > { %1713 = vmatpush3.bf16.msra.mxu0 %v1953_v1  ;;  %v1968_v16 = vld [vmem:[#allocation10] sm:$0xff]   ;;  %v1961_v19 = vld [vmem:[#allocation7 + $0x8] sm:$0xff]   ;;  %v468_v20 = vpack.c.bf16 %v455_v15, %v454_v14  ;;  %v456_v22 = vld [vmem:[%s2643_s20 + $0x30] sm:$0xff]  ;;  %p2222_p4 = pnand %p2221_p13, %p2532_p0 }
  0xd5   : > { %1714 = vmatprep.subr.bf16.mxu0 %v1954_v2  ;;  %1774 = vmatprep.subr.bf16.mxu1 %v1968_v16  ;;  %v457_v23 = vld [vmem:[%s2643_s20 + $0x38] sm:$0xff]  ;;  %v1962_v25 = vld [vmem:[#allocation7 + $0x10] sm:$0xff]   ;;  %v458_v26 = vld [vmem:[%s2643_s20 + $0x40] sm:$0xff] }
  0xd6   : > { %1775 = vmatpush3.bf16.msra.mxu1 %v1968_v16  ;;  %v1971_v24 = vld [vmem:[#allocation10 + $0x18] sm:$0xff]   ;;  %v459_v27 = vld [vmem:[%s2643_s20 + $0x48] sm:$0xff]  ;;  %v469_v28 = vpack.c.bf16 %v457_v23, %v456_v22  ;;  %v1972_v31 = vld [vmem:[#allocation10 + $0x20] sm:$0xff]   ;;  %p2223_p6 = pneg %p2222_p4 }
  0xd7   : > { %1776 = vmatprep.subr.bf16.mxu1 %v1969_v17  ;;  %v470_v29 = vpack.c.bf16 %v459_v27, %v458_v26  ;;  %v1963_v30 = vld [vmem:[#allocation7 + $0x18] sm:$0xff]   ;;  %v460_v32 = vld [vmem:[%s2643_s20 + $0x50] sm:$0xff]  ;;  %v1973_v34 = vld [vmem:[#allocation10 + $0x28] sm:$0xff]  }
  0xd8   : > { %1715 = vmatpush3.bf16.msra.mxu0 %v1954_v2  ;;  %v461_v33 = vld [vmem:[%s2643_s20 + $0x58] sm:$0xff]  ;;  %v1964_v35 = vld [vmem:[#allocation7 + $0x20] sm:$0xff]   ;;  %v463_v37 = vld [vmem:[%s2643_s20 + $0x68] sm:$0xff] }
  0xd9   : > { %1716 = vmatprep.subr.bf16.mxu0 %v1955_v3  ;;  %v462_v36 = vld [vmem:[%s2643_s20 + $0x60] sm:$0xff]  ;;  %v471_v38 = vpack.c.bf16 %v461_v33, %v460_v32  ;;  %v1965_v40 = vld [vmem:[#allocation7 + $0x28] sm:$0xff]   ;;  %v464_v41 = vld [vmem:[%s2643_s20 + $0x70] sm:$0xff] }
  0xda   : > { %1777 = vmatpush3.bf16.msra.mxu1 %v1969_v17  ;;  %v472_v39 = vpack.c.bf16 %v463_v37, %v462_v36  ;;  %v465_v42 = vld [vmem:[%s2643_s20 + $0x78] sm:$0xff]  ;;  %v1966_v43 = vld [vmem:[#allocation7 + $0x30] sm:$0xff]   ;;  %v426_v44 = vld [vmem:[%s2636_s15] sm:$0xff] }
  0xdb   : > { %1778 = vmatprep.subr.bf16.mxu1 %v1970_v21  ;;  %v427_v45 = vld [vmem:[%s2636_s15 + $0x8] sm:$0xff]  ;;  %v473_v46 = vpack.c.bf16 %v465_v42, %v464_v41  ;;  %v1967_v48 = vld [vmem:[#allocation7 + $0x38] sm:$0xff]   ;;  %v428_v49 = vld [vmem:[%s2636_s15 + $0x10] sm:$0xff] }
  0xdc   : > { %1717 = vmatpush3.bf16.msra.mxu0 %v1955_v3  ;;  %v442_v47 = vpack.c.bf16 %v427_v45, %v426_v44  ;;  %v429_v50 = vld [vmem:[%s2636_s15 + $0x18] sm:$0xff]  ;;  %v430_v51 = vld [vmem:[%s2636_s15 + $0x20] sm:$0xff]  ;;  %v431_v52 = vld [vmem:[%s2636_s15 + $0x28] sm:$0xff] }
  0xdd   : > { %1718 = vmatprep.subr.bf16.mxu0 %v1956_v7  ;;  %v443_v53 = vpack.c.bf16 %v429_v50, %v428_v49  ;;  %v444_v54 = vpack.c.bf16 %v431_v52, %v430_v51  ;;  %v432_v55 = vld [vmem:[%s2636_s15 + $0x30] sm:$0xff]  ;;  %v433_v56 = vld [vmem:[%s2636_s15 + $0x38] sm:$0xff]  ;;  %v434_v57 = vld [vmem:[%s2636_s15 + $0x40] sm:$0xff] }
  0xde   : > { %1779 = vmatpush3.bf16.msra.mxu1 %v1970_v21  ;;  %v435_v58 = vld [vmem:[%s2636_s15 + $0x48] sm:$0xff]  ;;  %v445_v59 = vpack.c.bf16 %v433_v56, %v432_v55  ;;  %v436_v61 = vld [vmem:[%s2636_s15 + $0x50] sm:$0xff]  ;;  %v437_v62 = vld [vmem:[%s2636_s15 + $0x58] sm:$0xff] }
  0xdf   : > { %1780 = vmatprep.subr.bf16.mxu1 %v1971_v24  ;;  %v446_v60 = vpack.c.bf16 %v435_v58, %v434_v57  ;;  %v438_v63 = vld [vmem:[%s2636_s15 + $0x60] sm:$0xff]  ;;  %v439_v0 = vld [vmem:[%s2636_s15 + $0x68] sm:$0xff]  ;;  %v447_v1 = vpack.c.bf16 %v437_v62, %v436_v61  ;;  %v440_v3 = vld [vmem:[%s2636_s15 + $0x70] sm:$0xff] }
  0xe0   : > { %1719 = vmatpush3.bf16.msra.mxu0 %v1956_v7  ;;  %v448_v2 = vpack.c.bf16 %v439_v0, %v438_v63  ;;  %v441_v4 = vld [vmem:[%s2636_s15 + $0x78] sm:$0xff]  ;;  %v1974_v6 = vld [vmem:[#allocation10 + $0x30] sm:$0xff]   ;;  %v1977_v27 = vld [vmem:[#allocation11 + $0x8] sm:$0xff]   ;;  %s2224_s15 = sshll.u32 %s2314_s19, 4  ;;  %s2225_s15 = int_to_ptr.vmem [resolvable:$false] %s2224_s15 }
  0xe1   : > { %1720 = vmatprep.subr.bf16.mxu0 %v1957_v8  ;;  %v449_v5 = vpack.c.bf16 %v441_v4, %v440_v3  ;;  %v1975_v7 = vld [vmem:[#allocation10 + $0x38] sm:$0xff]   ;;  %v1980_v51 = vld [vmem:[#allocation11 + $0x20] sm:$0xff]   ;;  %s2226_s2 = scalar_lea.vmem %s2225_s15, 2048  ;;  %p2227_p3 = scmp.lt.s32.totalorder %s2733_s0, %s2225_s15 }
  0xe2   : > { %1781 = vmatpush3.bf16.msra.mxu1 %v1971_v24  ;;  %p2228_p5 = scmp.lt.s32.totalorder %s2226_s2, %s2220_s9 }
  0xe3   : > { %1782 = vmatprep.subr.bf16.mxu1 %v1972_v31 }
  0xe4   : > { %1721 = vmatpush3.bf16.msra.mxu0 %v1957_v8  ;;  %v1976_v8 = vld [vmem:[#allocation11] sm:$0xff]   ;;  %p2229_p9 = por %p2228_p5, %p2227_p3 }
  0xe5   : > { %1722 = vmatprep.subr.bf16.mxu0 %v1958_v9 }
  0xe6   : > { %1783 = vmatpush3.bf16.msra.mxu1 %v1972_v31  ;;  %p2230_p8 = pnand %p2229_p9, %p2223_p6 }
  0xe7   : > { %1784 = vmatprep.subr.bf16.mxu1 %v1973_v34 }
  0xe8   : > { %1723 = vmatpush3.bf16.msra.mxu0 %v1958_v9  ;;  %v2696_v9 = vld [vmem:[%s2782_s4] ss:$0 sm:$0xff] }
  0xe9   : > { %1724 = vmatprep.subr.bf16.mxu0 %v1959_v10 }
  0xea   : > { %1785 = vmatpush3.bf16.msra.mxu1 %v1973_v34 }
  0xeb   : > { %1786 = vmatprep.subr.bf16.mxu1 %v1974_v6 }
  0xec   : > { %1725 = vmatpush3.bf16.msra.mxu0 %v1959_v10 }
  0xed   : > { %1742 = vmatprep.subr.bf16.mxu0 %v1960_v13 }
  0xee   : > { %1787 = vmatpush3.bf16.msra.mxu1 %v1974_v6 }
  0xef   : > { %1727 = vmatmul.mubr.bf16.vlgmr.msra.gmra.mrb[0].mxu0 %v467_v18  ;;  %1788 = vmatprep.subr.bf16.mxu1 %v1975_v7 }
  0xf0   : > { %1743 = vmatpush3.bf16.msra.mxu0 %v1960_v13  ;;  %1730 = vmatprep.mubr.bf16.mxu0 %v468_v20 }
  0xf1   : > { %1744 = vmatprep.subr.bf16.mxu0 %v1961_v19 }
  0xf2   : > { %1789 = vmatpush3.bf16.msra.mxu1 %v1975_v7  ;;  %v1982_v7 = vld [vmem:[#allocation11 + $0x30] sm:$0xff]  }
  0xf3   : > { %1806 = vmatprep.subr.bf16.mxu1 %v1976_v8 }
  0xf4   : > { %1745 = vmatpush3.bf16.msra.mxu0 %v1961_v19 }
  0xf5   : > { %1746 = vmatprep.subr.bf16.mxu0 %v1962_v25 }
  0xf7   : > { %1731 = vmatmul.mubr.bf16.gmra.mrb[4].mxu0 %v469_v28 }
  0xf8   : > { %1747 = vmatpush3.bf16.msra.mxu0 %v1962_v25  ;;  %1734 = vmatprep.mubr.bf16.mxu0 %v470_v29 }
  0xf9   : > { %1748 = vmatprep.subr.bf16.mxu0 %v1963_v30 }
  0xfc   : > { %1749 = vmatpush3.bf16.msra.mxu0 %v1963_v30 }
  0xfd   : > { %1750 = vmatprep.subr.bf16.mxu0 %v1964_v35 }
  0xff   : > { %1735 = vmatmul.mubr.bf16.gmra.mrb[8].mxu0 %v471_v38 }
 0x100   : > { %1751 = vmatpush3.bf16.msra.mxu0 %v1964_v35  ;;  %1738 = vmatprep.mubr.bf16.mxu0 %v472_v39  ;;  %v1978_v35 = vld [vmem:[#allocation11 + $0x10] sm:$0xff]  }
 0x101   : > { %1752 = vmatprep.subr.bf16.mxu0 %v1965_v40 }
 0x104   : > { %1753 = vmatpush3.bf16.msra.mxu0 %v1965_v40 }
 0x105   : > { %1754 = vmatprep.subr.bf16.mxu0 %v1966_v43 }
 0x107   : > { %1739 = vmatmul.mubr.bf16.gmra.mrb[12].mxu0 %v473_v46 }
 0x108   : > { %1755 = vmatpush3.bf16.msra.mxu0 %v1966_v43  ;;  %1758 = vmatprep.mubr.bf16.mxu0 %v442_v47  ;;  %v1979_v43 = vld [vmem:[#allocation11 + $0x18] sm:$0xff]  }
 0x109   : > { %1756 = vmatprep.subr.bf16.mxu0 %v1967_v48 }
 0x10c   : > { %1757 = vmatpush3.bf16.msra.mxu0 %v1967_v48 }
 0x10f   : > { %1759 = vmatmul.mubr.bf16.vlgmr.msra.gmra.mrb[0].mxu0 %v443_v53 }
 0x110   : > { %1762 = vmatprep.mubr.bf16.mxu0 %v444_v54 }
 0x117   : > { %1763 = vmatmul.mubr.bf16.gmra.mrb[4].mxu0 %v445_v59  ;;  %v1981_v59 = vld [vmem:[#allocation11 + $0x28] sm:$0xff]  }
 0x118   : > { %1766 = vmatprep.mubr.bf16.mxu0 %v446_v60 }
 0x11f   : > { %1767 = vmatmul.mubr.bf16.gmra.mrb[8].mxu0 %v447_v1 }
 0x120   : > { %1770 = vmatprep.mubr.bf16.mxu0 %v448_v2 }
 0x127   : > { %1771 = vmatmul.mubr.bf16.gmra.mrb[12].mxu0 %v449_v5 }
 0x1e2   : > { %v1760_v10 = vpop.f32.mrb[0].mxu0 }
 0x1e3   : > { %v805_v11 = vadd.f32 %v1760_v10, %v2696_v9  ;;  %v733_v12 = vpop.f32.mrb[1].mxu0 }
 0x1e4   : > { %v803_v13 = vadd.f32 %v2696_v9, %v733_v12  ;;  %v1761_v14 = vpop.f32.mrb[2].mxu0 }
 0x1e5   : > { %v806_v15 = vadd.f32 %v1761_v14, %v2696_v9  ;;  %v736_v16 = vpop.f32.mrb[3].mxu0  ;;  %v821_v18 = vmax.f32 %v805_v11, 0.0 }
 0x1e6   : > { %v804_v17 = vadd.f32 %v2696_v9, %v736_v16  ;;  %v819_v20 = vmax.f32 %v803_v13, 0.0 }
 0x1e7   : > { %v822_v19 = vmax.f32 %v806_v15, 0.0 }
 0x1e8   : > { %v820_v21 = vmax.f32 %v804_v17, 0.0 }
 0x1e9   : > { %v836_v22 = vpack.c.bf16 %v822_v19, %v821_v18 }
 0x1ea   : > { %v1764_v23 = vpop.f32.mrb[4].mxu0  ;;  %v835_v24 = vpack.c.bf16 %v820_v21, %v819_v20 }
 0x1eb   : > { %v809_v25 = vadd.f32 %v1764_v23, %v2696_v9  ;;  %v749_v26 = vpop.f32.mrb[5].mxu0 }
 0x1ec   : > { %v807_v28 = vadd.f32 %v2696_v9, %v749_v26  ;;  %v1765_v29 = vpop.f32.mrb[6].mxu0  ;;  %1790 = vmatprep.mubr.bf16.mxu1 %v835_v24 }
 0x1ed   : > { %v810_v30 = vadd.f32 %v1765_v29, %v2696_v9  ;;  %v752_v31 = vpop.f32.mrb[7].mxu0  ;;  %1791 = vmatmul.mubr.bf16.vlgmr.msra.gmra.mrb[0].mxu1 %v836_v22  ;;  %v825_v33 = vmax.f32 %v809_v25, 0.0 }
 0x1ee   : > { %v808_v32 = vadd.f32 %v2696_v9, %v752_v31  ;;  %1807 = vmatpush3.bf16.msra.mxu1 %v1976_v8  ;;  %v823_v36 = vmax.f32 %v807_v28, 0.0  ;;  %v1983_v8 = vld [vmem:[#allocation11 + $0x38] sm:$0xff]  }
 0x1ef   : > { %v826_v34 = vmax.f32 %v810_v30, 0.0  ;;  %1808 = vmatprep.subr.bf16.mxu1 %v1977_v27 }
 0x1f0   : > { %v824_v37 = vmax.f32 %v808_v32, 0.0 }
 0x1f1   : > { %v838_v38 = vpack.c.bf16 %v826_v34, %v825_v33 }
 0x1f2   : > { %v837_v39 = vpack.c.bf16 %v824_v37, %v823_v36  ;;  %v1768_v40 = vpop.f32.mrb[8].mxu0  ;;  %1809 = vmatpush3.bf16.msra.mxu1 %v1977_v27 }
 0x1f3   : > { %v813_v41 = vadd.f32 %v1768_v40, %v2696_v9  ;;  %v765_v42 = vpop.f32.mrb[9].mxu0  ;;  %1810 = vmatprep.subr.bf16.mxu1 %v1978_v35 }
 0x1f4   : > { %v811_v44 = vadd.f32 %v2696_v9, %v765_v42  ;;  %v1769_v45 = vpop.f32.mrb[10].mxu0  ;;  %1794 = vmatprep.mubr.bf16.mxu1 %v837_v39 }
 0x1f5   : > { %v814_v46 = vadd.f32 %v1769_v45, %v2696_v9  ;;  %v768_v47 = vpop.f32.mrb[11].mxu0  ;;  %1795 = vmatmul.mubr.bf16.gmra.mrb[4].mxu1 %v838_v38  ;;  %v829_v49 = vmax.f32 %v813_v41, 0.0 }
 0x1f6   : > { %v812_v48 = vadd.f32 %v2696_v9, %v768_v47  ;;  %1811 = vmatpush3.bf16.msra.mxu1 %v1978_v35  ;;  %v827_v52 = vmax.f32 %v811_v44, 0.0 }
 0x1f7   : > { %v830_v50 = vmax.f32 %v814_v46, 0.0  ;;  %1812 = vmatprep.subr.bf16.mxu1 %v1979_v43 }
 0x1f8   : > { %v828_v53 = vmax.f32 %v812_v48, 0.0 }
 0x1f9   : > { %v840_v54 = vpack.c.bf16 %v830_v50, %v829_v49 }
 0x1fa   : > { %v839_v55 = vpack.c.bf16 %v828_v53, %v827_v52  ;;  %v1772_v56 = vpop.f32.mrb[12].mxu0  ;;  %1813 = vmatpush3.bf16.msra.mxu1 %v1979_v43 }
 0x1fb   : > { %v817_v57 = vadd.f32 %v1772_v56, %v2696_v9  ;;  %v781_v58 = vpop.f32.mrb[13].mxu0  ;;  %1814 = vmatprep.subr.bf16.mxu1 %v1980_v51 }
 0x1fc   : > { %v815_v60 = vadd.f32 %v2696_v9, %v781_v58  ;;  %v1773_v61 = vpop.f32.mrb[14].mxu0  ;;  %1798 = vmatprep.mubr.bf16.mxu1 %v839_v55 }
 0x1fd   : > { %v818_v62 = vadd.f32 %v1773_v61, %v2696_v9  ;;  %v784_v63 = vpop.f32.mrb[15].mxu0  ;;  %1799 = vmatmul.mubr.bf16.gmra.mrb[8].mxu1 %v840_v54  ;;  %v833_v1 = vmax.f32 %v817_v57, 0.0 }
 0x1fe   : > { %v816_v0 = vadd.f32 %v2696_v9, %v784_v63  ;;  %1815 = vmatpush3.bf16.msra.mxu1 %v1980_v51  ;;  %v831_v3 = vmax.f32 %v815_v60, 0.0  ;;  %v1542_v9 = vld [vmem:[%s2784_s6] ss:$0 sm:$0xff] }
 0x1ff   : > { %v834_v2 = vmax.f32 %v818_v62, 0.0  ;;  %1816 = vmatprep.subr.bf16.mxu1 %v1981_v59 }
 0x200   : > { %v832_v4 = vmax.f32 %v816_v0, 0.0 }
 0x201   : > { %v842_v5 = vpack.c.bf16 %v834_v2, %v833_v1 }
 0x202   : > { %v841_v6 = vpack.c.bf16 %v832_v4, %v831_v3  ;;  %1817 = vmatpush3.bf16.msra.mxu1 %v1981_v59 }
 0x203   : > { %1818 = vmatprep.subr.bf16.mxu1 %v1982_v7 }
 0x204   : > { %1802 = vmatprep.mubr.bf16.mxu1 %v841_v6 }
 0x205   : > { %1803 = vmatmul.mubr.bf16.gmra.mrb[12].mxu1 %v842_v5 }
 0x206   : > { %1819 = vmatpush3.bf16.msra.mxu1 %v1982_v7 }
 0x207   : > { %1820 = vmatprep.subr.bf16.mxu1 %v1983_v8 }
 0x20a   : > { %1821 = vmatpush3.bf16.msra.mxu1 %v1983_v8 }
 0x2c0   : > { %v1792_v10 = vpop.f32.mrb[0].mxu1 }
 0x2c1   : > { %v957_v11 = vadd.f32 %v1792_v10, %v1542_v9  ;;  %v948_v12 = vpop.f32.mrb[1].mxu1 }
 0x2c2   : > { %v949_v13 = vadd.f32 %v1542_v9, %v948_v12  ;;  %v1793_v14 = vpop.f32.mrb[2].mxu1 }
 0x2c3   : > { %v960_v15 = vadd.f32 %v1793_v14, %v1542_v9  ;;  %v951_v16 = vpop.f32.mrb[3].mxu1  ;;  %v1013_v18 = vmax.f32 %v957_v11, 0.0 }
 0x2c4   : > { %v952_v17 = vadd.f32 %v1542_v9, %v951_v16  ;;  %v1011_v20 = vmax.f32 %v949_v13, 0.0 }
 0x2c5   : > { %v1014_v19 = vmax.f32 %v960_v15, 0.0 }
 0x2c6   : > { %v1012_v21 = vmax.f32 %v952_v17, 0.0 }
 0x2c7   : > { %v1028_v22 = vpack.c.bf16 %v1014_v19, %v1013_v18 }
 0x2c8   : > { %v1027_v23 = vpack.c.bf16 %v1012_v21, %v1011_v20  ;;  %v1796_v24 = vpop.f32.mrb[4].mxu1 }
 0x2c9   : > { %v973_v25 = vadd.f32 %v1796_v24, %v1542_v9  ;;  %v964_v26 = vpop.f32.mrb[5].mxu1 }
 0x2ca   : > { %v965_v27 = vadd.f32 %v1542_v9, %v964_v26  ;;  %v1797_v28 = vpop.f32.mrb[6].mxu1  ;;  %1822 = vmatprep.mubr.bf16.mxu1 %v1027_v23 }
 0x2cb   : > { %v976_v29 = vadd.f32 %v1797_v28, %v1542_v9  ;;  %v967_v30 = vpop.f32.mrb[7].mxu1  ;;  %1823 = vmatmul.mubr.bf16.vlgmr.msra.gmra.mrb[16].mxu1 %v1028_v22  ;;  %v1017_v32 = vmax.f32 %v973_v25, 0.0 }
 0x2cc   : > { %v968_v31 = vadd.f32 %v1542_v9, %v967_v30  ;;  %v1015_v34 = vmax.f32 %v965_v27, 0.0 }
 0x2cd   : > { %v1018_v33 = vmax.f32 %v976_v29, 0.0 }
 0x2ce   : > { %v1016_v35 = vmax.f32 %v968_v31, 0.0 }
 0x2cf   : > { %v1030_v36 = vpack.c.bf16 %v1018_v33, %v1017_v32 }
 0x2d0   : > { %v1029_v37 = vpack.c.bf16 %v1016_v35, %v1015_v34  ;;  %v1800_v38 = vpop.f32.mrb[8].mxu1 }
 0x2d1   : > { %v989_v39 = vadd.f32 %v1800_v38, %v1542_v9  ;;  %v980_v40 = vpop.f32.mrb[9].mxu1 }
 0x2d2   : > { %v981_v41 = vadd.f32 %v1542_v9, %v980_v40  ;;  %v1801_v42 = vpop.f32.mrb[10].mxu1  ;;  %1826 = vmatprep.mubr.bf16.mxu1 %v1029_v37 }
 0x2d3   : > { %v992_v43 = vadd.f32 %v1801_v42, %v1542_v9  ;;  %v983_v44 = vpop.f32.mrb[11].mxu1  ;;  %1827 = vmatmul.mubr.bf16.gmra.mrb[20].mxu1 %v1030_v36  ;;  %v1021_v46 = vmax.f32 %v989_v39, 0.0 }
 0x2d4   : > { %v984_v45 = vadd.f32 %v1542_v9, %v983_v44  ;;  %v1019_v48 = vmax.f32 %v981_v41, 0.0 }
 0x2d5   : > { %v1022_v47 = vmax.f32 %v992_v43, 0.0 }
 0x2d6   : > { %v1020_v49 = vmax.f32 %v984_v45, 0.0 }
 0x2d7   : > { %v1032_v50 = vpack.c.bf16 %v1022_v47, %v1021_v46 }
 0x2d8   : > { %v1031_v51 = vpack.c.bf16 %v1020_v49, %v1019_v48  ;;  %v1804_v52 = vpop.f32.mrb[12].mxu1 }
 0x2d9   : > { %v1005_v53 = vadd.f32 %v1804_v52, %v1542_v9  ;;  %v996_v54 = vpop.f32.mrb[13].mxu1 }
 0x2da   : > { %v997_v55 = vadd.f32 %v1542_v9, %v996_v54  ;;  %v1805_v56 = vpop.f32.mrb[14].mxu1  ;;  %1830 = vmatprep.mubr.bf16.mxu1 %v1031_v51 }
 0x2db   : > { %v1008_v57 = vadd.f32 %v1805_v56, %v1542_v9  ;;  %v999_v58 = vpop.f32.mrb[15].mxu1  ;;  %1831 = vmatmul.mubr.bf16.gmra.mrb[24].mxu1 %v1032_v50  ;;  %v1025_v60 = vmax.f32 %v1005_v53, 0.0 }
 0x2dc   : > { %v1000_v59 = vadd.f32 %v1542_v9, %v999_v58  ;;  %v1023_v62 = vmax.f32 %v997_v55, 0.0 }
 0x2dd   : > { %v1026_v61 = vmax.f32 %v1008_v57, 0.0 }
 0x2de   : > { %v1024_v63 = vmax.f32 %v1000_v59, 0.0 }
 0x2df   : > { %v1034_v0 = vpack.c.bf16 %v1026_v61, %v1025_v60 }
 0x2e0   : > { %v1033_v1 = vpack.c.bf16 %v1024_v63, %v1023_v62 }
 0x2e2   : > { %1834 = vmatprep.mubr.bf16.mxu1 %v1033_v1 }
 0x2e3   : > { %1835 = vmatmul.mubr.bf16.gmra.mrb[28].mxu1 %v1034_v0 }
 0x39e   : > { %v1824_v2 = vpop.f32.mrb[16].mxu1 }
 0x39f   : > { %v1198_v3 = vsub.f32 0.0, %v1824_v2  ;;  %v1133_v4 = vpop.f32.mrb[17].mxu1 }
 0x3a0   : > { %v1196_v5 = vsub.f32 0.0, %v1133_v4  ;;  %v1825_v6 = vpop.f32.mrb[18].mxu1 }
 0x3a1   : > { %v1216_v7 = vmul.f32 1.442695, %v1198_v3  ;;  %v1199_v8 = vsub.f32 0.0, %v1825_v6  ;;  %v1136_v10 = vpop.f32.mrb[19].mxu1 }
 0x3a2   : > { %v1212_v11 = vmul.f32 1.442695, %v1196_v5  ;;  %v1197_v12 = vsub.f32 0.0, %v1136_v10 }
 0x3a3   : > { %1984 = vpow2.f32 %v1216_v7  ;;  %v1218_v9 = vmul.f32 1.442695, %v1199_v8 }
 0x3a4   : > { %1986 = vpow2.f32 %v1212_v11  ;;  %v1214_v13 = vmul.f32 1.442695, %v1197_v12 }
 0x3a5   : > { %1988 = vpow2.f32 %v1218_v9 }
 0x3a6   : > { %1990 = vpow2.f32 %v1214_v13  ;;  %v1828_v14 = vpop.f32.mrb[20].mxu1 }
 0x3a7   : > { %v1202_v15 = vsub.f32 0.0, %v1828_v14  ;;  %v1149_v16 = vpop.f32.mrb[21].mxu1 }
 0x3a8   : > { %v1200_v17 = vsub.f32 0.0, %v1149_v16  ;;  %v1829_v18 = vpop.f32.mrb[22].mxu1 }
 0x3a9   : > { %v1224_v19 = vmul.f32 1.442695, %v1202_v15  ;;  %v1203_v20 = vsub.f32 0.0, %v1829_v18  ;;  %v1152_v21 = vpop.f32.mrb[23].mxu1 }
 0x3aa   : > { %v1220_v22 = vmul.f32 1.442695, %v1200_v17  ;;  %v1201_v23 = vsub.f32 0.0, %v1152_v21 }
 0x3ab   : > { %1992 = vpow2.f32 %v1224_v19  ;;  %v1226_v24 = vmul.f32 1.442695, %v1203_v20 }
 0x3ac   : > { %1994 = vpow2.f32 %v1220_v22  ;;  %v1222_v25 = vmul.f32 1.442695, %v1201_v23 }
 0x3ad   : > { %v1985_v26 = vpop.eup %1984  ;;  %1996 = vpow2.f32 %v1226_v24 }
 0x3ae   : > { %v1987_v27 = vpop.eup %1986  ;;  %v1246_v28 = vadd.f32 1.0, %v1985_v26  ;;  %1998 = vpow2.f32 %v1222_v25  ;;  %v1832_v29 = vpop.f32.mrb[24].mxu1 }
 0x3af   : > { %v1989_v30 = vpop.eup %1988  ;;  %v1244_v31 = vadd.f32 1.0, %v1987_v27  ;;  %v1206_v32 = vsub.f32 0.0, %v1832_v29  ;;  %v1165_v33 = vpop.f32.mrb[25].mxu1 }
 0x3b0   : > { %v1991_v34 = vpop.eup %1990  ;;  %2000 = vrcp.f32 %v1246_v28  ;;  %v1247_v35 = vadd.f32 1.0, %v1989_v30  ;;  %v1204_v36 = vsub.f32 0.0, %v1165_v33  ;;  %v1833_v37 = vpop.f32.mrb[26].mxu1 }
 0x3b1   : > { %2002 = vrcp.f32 %v1244_v31  ;;  %v1245_v38 = vadd.f32 1.0, %v1991_v34  ;;  %v1232_v39 = vmul.f32 1.442695, %v1206_v32  ;;  %v1207_v40 = vsub.f32 0.0, %v1833_v37  ;;  %v1168_v41 = vpop.f32.mrb[27].mxu1 }
 0x3b2   : > { %2004 = vrcp.f32 %v1247_v35  ;;  %v1228_v42 = vmul.f32 1.442695, %v1204_v36  ;;  %v1205_v43 = vsub.f32 0.0, %v1168_v41 }
 0x3b3   : > { %2006 = vrcp.f32 %v1245_v38  ;;  %v1234_v44 = vmul.f32 1.442695, %v1207_v40 }
 0x3b4   : > { %2008 = vpow2.f32 %v1232_v39  ;;  %v1230_v45 = vmul.f32 1.442695, %v1205_v43 }
 0x3b5   : > { %v1993_v46 = vpop.eup %1992  ;;  %2010 = vpow2.f32 %v1228_v42 }
 0x3b6   : > { %v1995_v47 = vpop.eup %1994  ;;  %v1250_v48 = vadd.f32 1.0, %v1993_v46  ;;  %2012 = vpow2.f32 %v1234_v44  ;;  %v1836_v49 = vpop.f32.mrb[28].mxu1 }
 0x3b7   : > { %v1997_v50 = vpop.eup %1996  ;;  %v1248_v51 = vadd.f32 1.0, %v1995_v47  ;;  %2014 = vpow2.f32 %v1230_v45  ;;  %v1210_v52 = vsub.f32 0.0, %v1836_v49  ;;  %v1181_v53 = vpop.f32.mrb[29].mxu1 }
 0x3b8   : > { %v1999_v54 = vpop.eup %1998  ;;  %2016 = vrcp.f32 %v1250_v48  ;;  %v1251_v55 = vadd.f32 1.0, %v1997_v50  ;;  %v1208_v56 = vsub.f32 0.0, %v1181_v53  ;;  %v1837_v57 = vpop.f32.mrb[30].mxu1 }
 0x3b9   : > { %2018 = vrcp.f32 %v1248_v51  ;;  %v1249_v58 = vadd.f32 1.0, %v1999_v54  ;;  %v1240_v59 = vmul.f32 1.442695, %v1210_v52  ;;  %v1211_v60 = vsub.f32 0.0, %v1837_v57  ;;  %v1184_v61 = vpop.f32.mrb[31].mxu1 }
 0x3ba   : > { %v2001_v62 = vpop.eup %2000  ;;  %2020 = vrcp.f32 %v1251_v55  ;;  %v1236_v63 = vmul.f32 1.442695, %v1208_v56  ;;  %v1209_v0 = vsub.f32 0.0, %v1184_v61 }
 0x3bb   : > { %v2003_v1 = vpop.eup %2002  ;;  %2022 = vrcp.f32 %v1249_v58  ;;  %v1242_v2 = vmul.f32 1.442695, %v1211_v60 }
 0x3bc   : > { %v2005_v3 = vpop.eup %2004  ;;  %2024 = vpow2.f32 %v1240_v59  ;;  %v1238_v4 = vmul.f32 1.442695, %v1209_v0 }
 0x3bd   : > { %v2007_v5 = vpop.eup %2006  ;;  %v1607_v6 = vpack.c.bf16 %v2005_v3, %v2001_v62  ;;  %2026 = vpow2.f32 %v1236_v63 }
 0x3be   : > { %v2009_v7 = vpop.eup %2008  ;;  %v1602_v8 = vpack.c.bf16 %v2007_v5, %v2003_v1  ;;  %2028 = vpow2.f32 %v1242_v2 }
 0x3bf   : > { %v2011_v10 = vpop.eup %2010  ;;  %1639 = vst [vmem:[%s2718_s18 + $0x8] sm:$0xff] %v1607_v6   ;;  %v1254_v11 = vadd.f32 1.0, %v2009_v7  ;;  %2030 = vpow2.f32 %v1238_v4 }
 0x3c0   : > { %v2013_v12 = vpop.eup %2012  ;;  %1603 = vst [vmem:[%s2718_s18] sm:$0xff] %v1602_v8   ;;  %v1252_v9 = vadd.f32 1.0, %v2011_v10 }
 0x3c1   : > { %v2015_v13 = vpop.eup %2014  ;;  %2032 = vrcp.f32 %v1254_v11  ;;  %v1255_v14 = vadd.f32 1.0, %v2013_v12 }
 0x3c2   : > { %v2017_v15 = vpop.eup %2016  ;;  %2034 = vrcp.f32 %v1252_v9  ;;  %v1253_v16 = vadd.f32 1.0, %v2015_v13 }
 0x3c3   : > { %v2019_v17 = vpop.eup %2018  ;;  %2036 = vrcp.f32 %v1255_v14 }
 0x3c4   : > { %v2021_v18 = vpop.eup %2020  ;;  %2038 = vrcp.f32 %v1253_v16 }
 0x3c5   : > { %v2023_v19 = vpop.eup %2022  ;;  %v1617_v20 = vpack.c.bf16 %v2021_v18, %v2017_v15 }
 0x3c6   : > { %v2025_v21 = vpop.eup %2024  ;;  %v1612_v22 = vpack.c.bf16 %v2023_v19, %v2019_v17 }
 0x3c7   : > { %v2027_v23 = vpop.eup %2026  ;;  %1641 = vst [vmem:[%s2718_s18 + $0x18] sm:$0xff] %v1617_v20   ;;  %v1258_v24 = vadd.f32 1.0, %v2025_v21 }
 0x3c8   : > { %v2029_v25 = vpop.eup %2028  ;;  %1640 = vst [vmem:[%s2718_s18 + $0x10] sm:$0xff] %v1612_v22   ;;  %v1256_v26 = vadd.f32 1.0, %v2027_v23 }
 0x3c9   : > { %v2031_v27 = vpop.eup %2030  ;;  %2040 = vrcp.f32 %v1258_v24  ;;  %v1259_v28 = vadd.f32 1.0, %v2029_v25 }
 0x3ca   : > { %2042 = vrcp.f32 %v1256_v26  ;;  %v1257_v29 = vadd.f32 1.0, %v2031_v27 }
 0x3cb   : > { %v2033_v30 = vpop.eup %2032  ;;  %2044 = vrcp.f32 %v1259_v28 }
 0x3cc   : > { %v2035_v31 = vpop.eup %2034  ;;  %2046 = vrcp.f32 %v1257_v29 }
 0x3cd   : > { %v2037_v32 = vpop.eup %2036 }
 0x3ce   : > { %v2039_v33 = vpop.eup %2038  ;;  %v1627_v34 = vpack.c.bf16 %v2037_v32, %v2033_v30 }
 0x3cf   : > { %v1622_v35 = vpack.c.bf16 %v2039_v33, %v2035_v31 }
 0x3d0   : > { %1643 = vst [vmem:[%s2718_s18 + $0x28] sm:$0xff] %v1627_v34  }
 0x3d1   : > { %1642 = vst [vmem:[%s2718_s18 + $0x20] sm:$0xff] %v1622_v35  }
 0x3d3   : > { %v2041_v36 = vpop.eup %2040 }
 0x3d4   : > { %v2043_v37 = vpop.eup %2042 }
 0x3d5   : > { %v2045_v38 = vpop.eup %2044 }
 0x3d6   : > { %v2047_v39 = vpop.eup %2046  ;;  %v1637_v40 = vpack.c.bf16 %v2045_v38, %v2041_v36 }
 0x3d7   : > { %v1632_v41 = vpack.c.bf16 %v2047_v39, %v2043_v37 }
 0x3d8   : > { %1645 = vst [vmem:[%s2718_s18 + $0x38] sm:$0xff] %v1637_v40  }
 0x3d9   : > { %1644 = vst [vmem:[%s2718_s18 + $0x30] sm:$0xff] %v1632_v41  }
 0x3da   : > { %2233 = shalt.err (!%p2230_p8)
}
 0x3db   : > { %s2234_s13 = scalar_lea.hbm %s2731_s12, 1024  ;;  %s2238_s27 = scalar_lea.hbm %s2786_s8, 4096 }
 0x3dc   : > { %p2235_p10 = scmp.ne.s32.totalorder %s2731_s12, %s2234_s13  ;;  %p2239_p1 = scmp.lt.u32.totalorder %s2731_s12, %s2786_s8 }
 0x3dd   : > { %p2240_p2 = scmp.lt.u32.totalorder %s2238_s27, %s2234_s13  ;;  %p2242_p13 = scmp.lt.u32.totalorder %s2234_s13, %s2731_s12 }
 0x3de   : > { %p2236_p7 = pnand %p2235_p10, %p2532_p0 }
 0x3df   : > { %p2241_p12 = por %p2240_p2, %p2239_p1 }
 0x3e0   : > { %p2237_p11 = pneg %p2236_p7 }
 0x3e1   : > { %p2243_p4 = por %p2242_p13, %p2241_p12 }
 0x3e3   : > { %p2244_p6 = pnand %p2243_p4, %p2237_p11 }
 0x3e5   : > { %2247 = shalt.err (!%p2244_p6)
}
 0x3e6   : > { %s2315_s22 = smov 64   ;;  %s2316_s18 = smov 4  }
 0x3e7   : > { %1874 = dma.vmem_to_hbm [thread:$0]  (%p2532_p0), %s2733_s0, 1024, %s2731_s12, %s1357_s14, %s2315_s22, %s2315_s22, %s2316_s18  }
 0x3e8 PF: > { %s2816_s17 = sld [smem:[#allocation20_spill]]  ;;  %s2817_s10 = sld [smem:[#allocation21_spill]] }
 0x3e9   : > { %p1909_p3 = scmp.ge.s32.totalorder %s2302_s30, 2 }
 0x3ee   : > { %s1385_s25 = sand.u32 1, %s2816_s17   ;;  %p2818_p5 = scmp.ne.s32.totalorder %s2817_s10, 0 }
 0x3ef   : > { %s1386_s9 = scalar_lea.sflag [#allocation4], %s1385_s25 }
 0x3f0   : > { %p1897_p9 = pnand %p1909_p3, %p2818_p5 }
 0x3f2   : > { %2285 = dma.done.wait (!%p1897_p9), %s1386_s9, 1024  }
 0x3f3   : > { %2287 = vsyncadd (!%p1897_p9), %s1386_s9, 4294966272  ;;  %p26_p8 = scmp.ge.s32.totalorder %s2522_s16, 6   ;;  %s2819_s27 = smov %s2294_s28 }
 0x3f4   : > { %s2820_s28 = smov %s2298_s29  ;;  %s2821_s29 = smov %s2538_s24 }
 0x3f5   : > { %s2822_s30 = smov %s2522_s16  ;;  %28 = sbr.rel (!%p26_p8) target bundleno = 13 (0xd), region = 126 }
 0x3fc   :  { %1391 = vsyncpa [#allocation3], 1 }
 0x3fd   :  { %1393 = vsyncpa [#allocation3 + $0x1], 1 }
 0x3fe   :  { %1394 = vsyncpa [#allocation6], 1 }
 0x3ff   :  { %1396 = vsyncpa [#allocation6 + $0x1], 1 }
 0x400   :  { %1397 = vsyncpa [#allocation9], 1 }
 0x401   :  { %1398 = vsyncpa [#allocation12], 1 }
 0x402   :  { %1399 = vsyncpa [#allocation4], 1 }
 0x403   :  { %1401 = vsyncpa [#allocation4 + $0x1], 1 }

</bundles_post_ra>
